<compile_context>
chip_gen: v5e
topology: v5e:2x2
jax: 0.10.0
libtpu: 0.0.40
codegen_flags: <defaults>
</compile_context>

<pallas_src>
import functools

import jax
import jax.numpy as jnp
from jax.experimental import pallas as pl
from jax.experimental.pallas import tpu as pltpu

_VMEM_LIMIT_BYTES = 32 * 1024 * 1024  # explicit, v7x-safe scoped-VMEM limit


def _cparams(dims):
    return pltpu.CompilerParams(dimension_semantics=dims,
                                vmem_limit_bytes=_VMEM_LIMIT_BYTES)


def _row_tile(n, cap=512):
    """Largest row tile <= cap that divides n (multiple of 8 when tiling)."""
    if n <= cap:
        return n
    t = cap - (cap % 8)
    while t >= 8:
        if n % t == 0:
            return t
        t -= 8
    return n


# ----------------------------------------------------------------------------
# Kernel 1: sequence-level input projection  x @ [W_ir|W_iz|W_in] + folded bias
# ----------------------------------------------------------------------------
def input_proj_kernel(x_ref, wi_ref, bi_ref, out_ref):
    # x_ref: (TM, Din), wi_ref: (1, Din, 3H), bi_ref: (1, 1, 3H), out: (1, TM, 3H)
    out_ref[0] = (jnp.dot(x_ref[...], wi_ref[0],
                          preferred_element_type=jnp.float32) + bi_ref[0])


def gru_input_projection(x2d, wi, bi):
    """x2d: (T*B, Din) f32; wi: (ND, Din, 3H); bi: (ND, 1, 3H) -> (ND, T*B, 3H)."""
    M, Din = x2d.shape
    ND, _, H3 = wi.shape
    TM = _row_tile(M)
    return pl.pallas_call(
        input_proj_kernel,
        out_shape=jax.ShapeDtypeStruct((ND, M, H3), jnp.float32),
        grid=(ND, M // TM),
        in_specs=[
            pl.BlockSpec((TM, Din), lambda d, m: (m, 0)),
            pl.BlockSpec((1, Din, H3), lambda d, m: (d, 0, 0)),
            pl.BlockSpec((1, 1, H3), lambda d, m: (d, 0, 0)),
        ],
        out_specs=pl.BlockSpec((1, TM, H3), lambda d, m: (d, m, 0)),
        compiler_params=_cparams(("parallel", "parallel")),
    )(x2d, wi, bi)


# ----------------------------------------------------------------------------
# Kernel 2: GRU recurrence, time-tiled.  PyTorch gate semantics (r, z, n):
#   r = sigmoid(xp_r + h Wh_r)         (b_ir + b_hr folded into xp_r)
#   z = sigmoid(xp_z + h Wh_z)         (b_iz + b_hz folded into xp_z)
#   n = tanh  (xp_n + r * (h Wh_n + b_hn))
#   h' = (1 - z) * n + z * h
# ----------------------------------------------------------------------------
def gru_recurrence_kernel(xp_ref, wh_ref, bhn_ref, out_ref, h_ref):
    H = h_ref.shape[-1]
    t = pl.program_id(1)

    @pl.when(t == 0)
    def _():
        h_ref[...] = jnp.zeros_like(h_ref)

    h = h_ref[...]                                                     # (B, H)
    xp = xp_ref[0, 0]                                                  # (B, 3H)
    gh = jnp.dot(h, wh_ref[0], preferred_element_type=jnp.float32)     # (B, 3H)
    r = jax.nn.sigmoid(xp[:, :H] + gh[:, :H])
    z = jax.nn.sigmoid(xp[:, H:2 * H] + gh[:, H:2 * H])
    n = jnp.tanh(xp[:, 2 * H:] + r * (gh[:, 2 * H:] + bhn_ref[0]))
    h_new = (1.0 - z) * n + z * h
    h_ref[...] = h_new
    out_ref[0, 0] = h_new


def gru_recurrence(x_proj, wh, bhn, T, B, H):
    """x_proj: (ND, T, B, 3H); wh: (ND, H, 3H); bhn: (ND, 1, H) -> (ND, T, B, H)."""
    ND = wh.shape[0]

    def time_idx(d, t):
        # forward direction (d==0) walks t; backward (d==1) walks T-1-t.
        return t + d * (T - 1 - 2 * t)

    return pl.pallas_call(
        gru_recurrence_kernel,
        out_shape=jax.ShapeDtypeStruct((ND, T, B, H), jnp.float32),
        grid=(ND, T),
        in_specs=[
            pl.BlockSpec((1, 1, B, 3 * H), lambda d, t: (d, time_idx(d, t), 0, 0)),
            pl.BlockSpec((1, H, 3 * H), lambda d, t: (d, 0, 0)),
            pl.BlockSpec((1, 1, H), lambda d, t: (d, 0, 0)),
        ],
        out_specs=pl.BlockSpec((1, 1, B, H), lambda d, t: (d, time_idx(d, t), 0, 0)),
        scratch_shapes=[pltpu.VMEM((B, H), jnp.float32)],
        compiler_params=_cparams(("parallel", "arbitrary")),
    )(x_proj, wh, bhn)


# ----------------------------------------------------------------------------
# Kernel 3: classifier head, reduction-tiled over (direction, time).
# Linear(flat,128) accumulated in VMEM -> LeakyReLU -> (Dropout=id) ->
# Linear(128,1) -> Sigmoid, all fused; the permute+flatten is expressed via
# the w1 index_map instead of materializing rnn_flat.
# ----------------------------------------------------------------------------
def head_kernel(rnn_ref, w1_ref, b1_ref, w2_ref, b2_ref, out_ref, acc_ref):
    d = pl.program_id(0)
    t = pl.program_id(1)

    @pl.when((d == 0) & (t == 0))
    def _():
        acc_ref[...] = jnp.zeros_like(acc_ref)

    acc_ref[...] += jnp.dot(rnn_ref[0, 0], w1_ref[0, 0],
                            preferred_element_type=jnp.float32)

    @pl.when((d == pl.num_programs(0) - 1) & (t == pl.num_programs(1) - 1))
    def _():
        h = acc_ref[...] + b1_ref[...]
        h = jnp.where(h >= 0.0, h, 0.01 * h)   # nn.LeakyReLU negative_slope=0.01
        # nn.Dropout: identity at inference.
        # TODO(synk): training-mode dropout (pltpu.prng_random_bits) not implemented.
        o = jnp.dot(h, w2_ref[...], preferred_element_type=jnp.float32) + b2_ref[...]
        out_ref[...] = jax.nn.sigmoid(o)


def classifier_head(rnn_out, w1, b1, w2, b2):
    """rnn_out: (ND, T, B, H); w1: (T*ND*H, 128) -> (B, 1)."""
    ND, T, B, H = rnn_out.shape
    w1r = w1.reshape(T, ND, H, 128)  # flat feature index = (t*ND + d)*H + h
    return pl.pallas_call(
        head_kernel,
        out_shape=jax.ShapeDtypeStruct((B, 1), jnp.float32),
        grid=(ND, T),
        in_specs=[
            pl.BlockSpec((1, 1, B, H), lambda d, t: (d, t, 0, 0)),
            pl.BlockSpec((1, 1, H, 128), lambda d, t: (t, d, 0, 0)),
            pl.BlockSpec((1, 128), lambda d, t: (0, 0)),
            pl.BlockSpec((128, 1), lambda d, t: (0, 0)),
            pl.BlockSpec((1, 1), lambda d, t: (0, 0)),
        ],
        out_specs=pl.BlockSpec((B, 1), lambda d, t: (0, 0)),
        scratch_shapes=[pltpu.VMEM((B, 128), jnp.float32)],
        compiler_params=_cparams(("arbitrary", "arbitrary")),
    )(rnn_out, w1r, b1, w2, b2)


# ----------------------------------------------------------------------------
# Full forward pass.
# ----------------------------------------------------------------------------
def rnn_classifier_forward(inputs, params, *, num_layers, bidirectional):
    B, T = inputs.shape
    num_dirs = 2 if bidirectional else 1

    # Embedding gather stays in plain JAX (data-dependent gather).
    emb = jnp.take(params["embedding"], inputs, axis=0)        # (B, T, E)
    x = jnp.transpose(emb, (1, 0, 2)).astype(jnp.float32)      # (T, B, E) time-major

    dir_out = None
    for layer in range(num_layers):
        lp = params["gru"][layer]
        d_in = x.shape[-1]
        H = lp["wh"].shape[1]
        x2d = x.reshape(T * B, d_in)                           # free reshape
        xp = gru_input_projection(x2d, lp["wi"], lp["bi"])     # (ND, T*B, 3H)
        xp = xp.reshape(num_dirs, T, B, 3 * H)                 # free reshape
        dir_out = gru_recurrence(xp, lp["wh"], lp["bhn"], T, B, H)  # (ND, T, B, H)
        if layer + 1 < num_layers:
            # Only between stacked layers do we materialize the concat layout.
            x = jnp.transpose(dir_out, (1, 2, 0, 3)).reshape(T, B, num_dirs * H)

    return classifier_head(dir_out, params["w1"], params["b1"],
                           params["w2"], params["b2"])


# ----------------------------------------------------------------------------
# Deterministic parameter initialization (shapes follow the nn.Module); GRU
# weights are stored pre-fused: wi=(Din,3H), wh=(H,3H), gate order [r|z|n],
# with b_ir+b_hr and b_iz+b_hz folded into the input-projection bias.
# ----------------------------------------------------------------------------
def _uniform(key, shape, bound):
    return jax.random.uniform(key, shape, jnp.float32, -bound, bound)


def make_gru_layer_params(key, d_in, hidden, num_dirs):
    bound = hidden ** -0.5
    wi, bi, wh, bhn = [], [], [], []
    for d in range(num_dirs):
        ks = jax.random.split(jax.random.fold_in(key, d), 12)
        w_ir, w_iz, w_in = (_uniform(ks[i], (d_in, hidden), bound) for i in range(3))
        w_hr, w_hz, w_hn = (_uniform(ks[3 + i], (hidden, hidden), bound) for i in range(3))
        b_ir, b_iz, b_in = (_uniform(ks[6 + i], (1, hidden), bound) for i in range(3))
        b_hr, b_hz, b_hn = (_uniform(ks[9 + i], (1, hidden), bound) for i in range(3))
        wi.append(jnp.concatenate([w_ir, w_iz, w_in], axis=1))                  # (Din, 3H)
        bi.append(jnp.concatenate([b_ir + b_hr, b_iz + b_hz, b_in], axis=1))    # (1, 3H)
        wh.append(jnp.concatenate([w_hr, w_hz, w_hn], axis=1))                  # (H, 3H)
        bhn.append(b_hn)                                                        # (1, H)
    return dict(wi=jnp.stack(wi), bi=jnp.stack(bi),
                wh=jnp.stack(wh), bhn=jnp.stack(bhn))


def init_params(key, *, vocab_size, embed_dim, hidden, num_layers,
                bidirectional, seq_len):
    num_dirs = 2 if bidirectional else 1
    k_emb, k_gru, k_l1, k_l2 = jax.random.split(key, 4)

    params = {"embedding": jax.random.normal(k_emb, (vocab_size + 1, embed_dim),
                                             jnp.float32)}

    layers = []
    for layer in range(num_layers):
        d_in = embed_dim if layer == 0 else hidden * num_dirs
        layers.append(make_gru_layer_params(jax.random.fold_in(k_gru, layer),
                                            d_in, hidden, num_dirs))
    params["gru"] = layers

    flat_dim = seq_len * hidden * num_dirs      # == self.shape_data(x)
    b1 = flat_dim ** -0.5
    b2 = 128 ** -0.5
    k1a, k1b = jax.random.split(k_l1)
    k2a, k2b = jax.random.split(k_l2)
    params["w1"] = _uniform(k1a, (flat_dim, 128), b1)
    params["b1"] = _uniform(k1b, (1, 128), b1)
    params["w2"] = _uniform(k2a, (128, 1), b2)
    params["b2"] = _uniform(k2b, (1, 1), b2)
    return params


if __name__ == "__main__":
    # Small shapes consistent with the module's forward.
    batch, seq_len = 2, 8
    vocab_size, embed_dim, hidden = 50, 16, 32
    num_layers, bidirectional = 1, True

    params = init_params(jax.random.PRNGKey(1),
                         vocab_size=vocab_size, embed_dim=embed_dim,
                         hidden=hidden, num_layers=num_layers,
                         bidirectional=bidirectional, seq_len=seq_len)

    inputs = jax.random.randint(jax.random.PRNGKey(0), (batch, seq_len),
                                0, vocab_size + 1, dtype=jnp.int32)

    fwd = jax.jit(functools.partial(rnn_classifier_forward,
                                    num_layers=num_layers,
                                    bidirectional=bidirectional))
    out = jax.block_until_ready(fwd(inputs, params))

    assert out.shape == (batch, 1)
    assert bool(jnp.all((out >= 0.0) & (out <= 1.0)))
    print("KERNEL_OK")
</pallas_src>

<mosaic_0001>
module attributes {stable_mosaic.version = 11 : i64} {
  func.func @input_proj_kernel(%arg0: i32, %arg1: i32, %arg2: memref<16x16xf32, #tpu.memory_space<vmem>>, %arg3: memref<1x16x96xf32, #tpu.memory_space<vmem>>, %arg4: memref<1x1x96xf32, #tpu.memory_space<vmem>>, %arg5: memref<1x16x96xf32, #tpu.memory_space<vmem>>) attributes {dimension_semantics = [#tpu.dimension_semantics<parallel>, #tpu.dimension_semantics<parallel>], iteration_bounds = array<i64: 2, 1>, scalar_prefetch = 0 : i64, scratch_operands = 0 : i64, tpu.core_type = #tpu.core_type<tc>, window_params = [{transform_indices = @transform_0, window_bounds = array<i64: 16, 16>}, {transform_indices = @transform_1, window_bounds = array<i64: 1, 16, 96>}, {transform_indices = @transform_2, window_bounds = array<i64: 1, 1, 96>}, {transform_indices = @transform_3, window_bounds = array<i64: 1, 16, 96>}]} {
    %c0 = arith.constant 0 : index
    %c0_0 = arith.constant 0 : index
    %0 = vector.load %arg2[%c0, %c0_0] : memref<16x16xf32, #tpu.memory_space<vmem>>, vector<16x16xf32>
    %c0_1 = arith.constant 0 : index
    %c0_2 = arith.constant 0 : index
    %c0_3 = arith.constant 0 : index
    %1 = vector.load %arg3[%c0_1, %c0_2, %c0_3] : memref<1x16x96xf32, #tpu.memory_space<vmem>>, vector<1x16x96xf32>
    %2 = vector.shape_cast %1 : vector<1x16x96xf32> to vector<16x96xf32>
    %cst = arith.constant dense<0.000000e+00> : vector<16x96xf32>
    %3 = tpu.matmul %0, %2, %cst {dimension_numbers = #tpu.dot_dimension_numbers<[1], [0], [0], [1], [0, 0, 1, 1], [], []>} : vector<16x16xf32>, vector<16x96xf32>, vector<16x96xf32> -> vector<16x96xf32>
    %c0_4 = arith.constant 0 : index
    %c0_5 = arith.constant 0 : index
    %c0_6 = arith.constant 0 : index
    %4 = vector.load %arg4[%c0_4, %c0_5, %c0_6] : memref<1x1x96xf32, #tpu.memory_space<vmem>>, vector<1x1x96xf32>
    %5 = vector.shape_cast %4 : vector<1x1x96xf32> to vector<1x96xf32>
    %6 = vector.broadcast %5 : vector<1x96xf32> to vector<16x96xf32>
    %7 = arith.addf %3, %6 : vector<16x96xf32>
    %c0_7 = arith.constant 0 : index
    %c0_8 = arith.constant 0 : index
    %c0_9 = arith.constant 0 : index
    %8 = vector.load %arg5[%c0_7, %c0_8, %c0_9] : memref<1x16x96xf32, #tpu.memory_space<vmem>>, vector<1x16x96xf32>
    %9 = vector.shape_cast %8 : vector<1x16x96xf32> to vector<16x96xf32>
    %10 = vector.shape_cast %7 : vector<16x96xf32> to vector<1x16x96xf32>
    tpu.vector_store %arg5[%c0_7, %c0_8, %c0_9], %10 {strides = array<i32>} : memref<1x16x96xf32, #tpu.memory_space<vmem>>, vector<1x16x96xf32>,
    return
  }
  func.func @transform_0(%arg0: i32, %arg1: i32) -> (i32, i32) {
    %c0_i32 = arith.constant 0 : i32
    %c0_i32_0 = arith.constant 0 : i32
    return %arg1, %c0_i32 : i32, i32
  }
  func.func @transform_1(%arg0: i32, %arg1: i32) -> (i32, i32, i32) {
    %c0_i32 = arith.constant 0 : i32
    %c0_i32_0 = arith.constant 0 : i32
    %c0_i32_1 = arith.constant 0 : i32
    return %arg0, %c0_i32, %c0_i32_0 : i32, i32, i32
  }
  func.func @transform_2(%arg0: i32, %arg1: i32) -> (i32, i32, i32) {
    %c0_i32 = arith.constant 0 : i32
    %c0_i32_0 = arith.constant 0 : i32
    %c0_i32_1 = arith.constant 0 : i32
    return %arg0, %c0_i32, %c0_i32_0 : i32, i32, i32
  }
  func.func @transform_3(%arg0: i32, %arg1: i32) -> (i32, i32, i32) {
    %c0_i32 = arith.constant 0 : i32
    %c0_i32_0 = arith.constant 0 : i32
    return %arg0, %arg1, %c0_i32 : i32, i32, i32
  }
}

module attributes {stable_mosaic.version = 11 : i64} {
  func.func @gru_recurrence_kernel(%arg0: i32, %arg1: i32, %arg2: memref<1x1x2x96xf32, #tpu.memory_space<vmem>>, %arg3: memref<1x32x96xf32, #tpu.memory_space<vmem>>, %arg4: memref<1x1x32xf32, #tpu.memory_space<vmem>>, %arg5: memref<1x1x2x32xf32, #tpu.memory_space<vmem>>, %arg6: memref<2x32xf32, #tpu.memory_space<vmem>>) attributes {dimension_semantics = [#tpu.dimension_semantics<parallel>, #tpu.dimension_semantics<arbitrary>], iteration_bounds = array<i64: 2, 8>, scalar_prefetch = 0 : i64, scratch_operands = 1 : i64, tpu.core_type = #tpu.core_type<tc>, window_params = [{transform_indices = @transform_0, window_bounds = array<i64: 1, 1, 2, 96>}, {transform_indices = @transform_1, window_bounds = array<i64: 1, 32, 96>}, {transform_indices = @transform_2, window_bounds = array<i64: 1, 1, 32>}, {transform_indices = @transform_3, window_bounds = array<i64: 1, 1, 2, 32>}]} {
    %c0_i32 = arith.constant 0 : i32
    %0 = arith.cmpi eq, %arg1, %c0_i32 : i32
    %1 = arith.extui %0 : i1 to i32
    %c0_i32_0 = arith.constant 0 : i32
    %2 = arith.cmpi ne, %1, %c0_i32_0 : i32
    scf.if %2 {
      %cst_21 = arith.constant 0.000000e+00 : f32
      %43 = vector.broadcast %cst_21 : f32 to vector<2x32xf32>
      %c0_22 = arith.constant 0 : index
      %c0_23 = arith.constant 0 : index
      %44 = vector.load %arg6[%c0_22, %c0_23] : memref<2x32xf32, #tpu.memory_space<vmem>>, vector<2x32xf32>
      tpu.vector_store %arg6[%c0_22, %c0_23], %43 {strides = array<i32>} : memref<2x32xf32, #tpu.memory_space<vmem>>, vector<2x32xf32>,
    } else {
    }
    %c0 = arith.constant 0 : index
    %c0_1 = arith.constant 0 : index
    %3 = vector.load %arg6[%c0, %c0_1] : memref<2x32xf32, #tpu.memory_space<vmem>>, vector<2x32xf32>
    %c0_2 = arith.constant 0 : index
    %c0_3 = arith.constant 0 : index
    %c0_4 = arith.constant 0 : index
    %c0_5 = arith.constant 0 : index
    %4 = vector.load %arg2[%c0_2, %c0_3, %c0_4, %c0_5] : memref<1x1x2x96xf32, #tpu.memory_space<vmem>>, vector<1x1x2x96xf32>
    %5 = vector.shape_cast %4 : vector<1x1x2x96xf32> to vector<2x96xf32>
    %c0_6 = arith.constant 0 : index
    %c0_7 = arith.constant 0 : index
    %c0_8 = arith.constant 0 : index
    %6 = vector.load %arg3[%c0_6, %c0_7, %c0_8] : memref<1x32x96xf32, #tpu.memory_space<vmem>>, vector<1x32x96xf32>
    %7 = vector.shape_cast %6 : vector<1x32x96xf32> to vector<32x96xf32>
    %cst = arith.constant dense<0.000000e+00> : vector<2x96xf32>
    %8 = tpu.matmul %3, %7, %cst {dimension_numbers = #tpu.dot_dimension_numbers<[1], [0], [0], [1], [0, 0, 1, 1], [], []>} : vector<2x32xf32>, vector<32x96xf32>, vector<2x96xf32> -> vector<2x96xf32>
    %9 = vector.extract_strided_slice %5 {offsets = [0, 0], sizes = [2, 32], strides = [1, 1]} : vector<2x96xf32> to vector<2x32xf32>
    %10 = vector.extract_strided_slice %8 {offsets = [0, 0], sizes = [2, 32], strides = [1, 1]} : vector<2x96xf32> to vector<2x32xf32>
    %11 = arith.addf %9, %10 : vector<2x32xf32>
    %12 = arith.negf %11 : vector<2x32xf32>
    %13 = math.exp %12 : vector<2x32xf32>
    %cst_9 = arith.constant 1.000000e+00 : f32
    %14 = vector.broadcast %cst_9 : f32 to vector<2x32xf32>
    %15 = arith.addf %14, %13 : vector<2x32xf32>
    %16 = arith.divf %14, %15 : vector<2x32xf32>
    %17 = vector.extract_strided_slice %5 {offsets = [0, 32], sizes = [2, 32], strides = [1, 1]} : vector<2x96xf32> to vector<2x32xf32>
    %18 = vector.extract_strided_slice %8 {offsets = [0, 32], sizes = [2, 32], strides = [1, 1]} : vector<2x96xf32> to vector<2x32xf32>
    %19 = arith.addf %17, %18 : vector<2x32xf32>
    %20 = arith.negf %19 : vector<2x32xf32>
    %21 = math.exp %20 : vector<2x32xf32>
    %cst_10 = arith.constant 1.000000e+00 : f32
    %22 = vector.broadcast %cst_10 : f32 to vector<2x32xf32>
    %23 = arith.addf %22, %21 : vector<2x32xf32>
    %24 = arith.divf %22, %23 : vector<2x32xf32>
    %25 = vector.extract_strided_slice %5 {offsets = [0, 64], sizes = [2, 32], strides = [1, 1]} : vector<2x96xf32> to vector<2x32xf32>
    %26 = vector.extract_strided_slice %8 {offsets = [0, 64], sizes = [2, 32], strides = [1, 1]} : vector<2x96xf32> to vector<2x32xf32>
    %c0_11 = arith.constant 0 : index
    %c0_12 = arith.constant 0 : index
    %c0_13 = arith.constant 0 : index
    %27 = vector.load %arg4[%c0_11, %c0_12, %c0_13] : memref<1x1x32xf32, #tpu.memory_space<vmem>>, vector<1x1x32xf32>
    %28 = vector.shape_cast %27 : vector<1x1x32xf32> to vector<1x32xf32>
    %29 = vector.broadcast %28 : vector<1x32xf32> to vector<2x32xf32>
    %30 = arith.addf %26, %29 : vector<2x32xf32>
    %31 = arith.mulf %16, %30 : vector<2x32xf32>
    %32 = arith.addf %25, %31 : vector<2x32xf32>
    %33 = math.tanh %32 : vector<2x32xf32>
    %cst_14 = arith.constant 1.000000e+00 : f32
    %34 = vector.broadcast %cst_14 : f32 to vector<2x32xf32>
    %35 = arith.subf %34, %24 : vector<2x32xf32>
    %36 = arith.mulf %35, %33 : vector<2x32xf32>
    %37 = arith.mulf %24, %3 : vector<2x32xf32>
    %38 = arith.addf %36, %37 : vector<2x32xf32>
    %c0_15 = arith.constant 0 : index
    %c0_16 = arith.constant 0 : index
    %39 = vector.load %arg6[%c0_15, %c0_16] : memref<2x32xf32, #tpu.memory_space<vmem>>, vector<2x32xf32>
    tpu.vector_store %arg6[%c0_15, %c0_16], %38 {strides = array<i32>} : memref<2x32xf32, #tpu.memory_space<vmem>>, vector<2x32xf32>,
    %c0_17 = arith.constant 0 : index
    %c0_18 = arith.constant 0 : index
    %c0_19 = arith.constant 0 : index
    %c0_20 = arith.constant 0 : index
    %40 = vector.load %arg5[%c0_17, %c0_18, %c0_19, %c0_20] : memref<1x1x2x32xf32, #tpu.memory_space<vmem>>, vector<1x1x2x32xf32>
    %41 = vector.shape_cast %40 : vector<1x1x2x32xf32> to vector<2x32xf32>
    %42 = vector.shape_cast %38 : vector<2x32xf32> to vector<1x1x2x32xf32>
    tpu.vector_store %arg5[%c0_17, %c0_18, %c0_19, %c0_20], %42 {strides = array<i32>} : memref<1x1x2x32xf32, #tpu.memory_space<vmem>>, vector<1x1x2x32xf32>,
    return
  }
  func.func @transform_0(%arg0: i32, %arg1: i32) -> (i32, i32, i32, i32) {
    %c2_i32 = arith.constant 2 : i32
    %0 = arith.muli %c2_i32, %arg1 : i32
    %c7_i32 = arith.constant 7 : i32
    %1 = arith.subi %c7_i32, %0 : i32
    %2 = arith.muli %arg0, %1 : i32
    %3 = arith.addi %arg1, %2 : i32
    %c0_i32 = arith.constant 0 : i32
    %c0_i32_0 = arith.constant 0 : i32
    %c0_i32_1 = arith.constant 0 : i32
    return %arg0, %3, %c0_i32, %c0_i32_0 : i32, i32, i32, i32
  }
  func.func @transform_1(%arg0: i32, %arg1: i32) -> (i32, i32, i32) {
    %c0_i32 = arith.constant 0 : i32
    %c0_i32_0 = arith.constant 0 : i32
    %c0_i32_1 = arith.constant 0 : i32
    return %arg0, %c0_i32, %c0_i32_0 : i32, i32, i32
  }
  func.func @transform_2(%arg0: i32, %arg1: i32) -> (i32, i32, i32) {
    %c0_i32 = arith.constant 0 : i32
    %c0_i32_0 = arith.constant 0 : i32
    %c0_i32_1 = arith.constant 0 : i32
    return %arg0, %c0_i32, %c0_i32_0 : i32, i32, i32
  }
  func.func @transform_3(%arg0: i32, %arg1: i32) -> (i32, i32, i32, i32) {
    %c2_i32 = arith.constant 2 : i32
    %0 = arith.muli %c2_i32, %arg1 : i32
    %c7_i32 = arith.constant 7 : i32
    %1 = arith.subi %c7_i32, %0 : i32
    %2 = arith.muli %arg0, %1 : i32
    %3 = arith.addi %arg1, %2 : i32
    %c0_i32 = arith.constant 0 : i32
    %c0_i32_0 = arith.constant 0 : i32
    %c0_i32_1 = arith.constant 0 : i32
    return %arg0, %3, %c0_i32, %c0_i32_0 : i32, i32, i32, i32
  }
}

module attributes {stable_mosaic.version = 11 : i64} {
  func.func @head_kernel(%arg0: i32, %arg1: i32, %arg2: memref<1x1x2x32xf32, #tpu.memory_space<vmem>>, %arg3: memref<1x1x32x128xf32, #tpu.memory_space<vmem>>, %arg4: memref<1x128xf32, #tpu.memory_space<vmem>>, %arg5: memref<128x1xf32, #tpu.memory_space<vmem>>, %arg6: memref<1x1xf32, #tpu.memory_space<vmem>>, %arg7: memref<2x1xf32, #tpu.memory_space<vmem>>, %arg8: memref<2x128xf32, #tpu.memory_space<vmem>>) attributes {dimension_semantics = [#tpu.dimension_semantics<arbitrary>, #tpu.dimension_semantics<arbitrary>], iteration_bounds = array<i64: 2, 8>, scalar_prefetch = 0 : i64, scratch_operands = 1 : i64, tpu.core_type = #tpu.core_type<tc>, window_params = [{transform_indices = @transform_0, window_bounds = array<i64: 1, 1, 2, 32>}, {transform_indices = @transform_1, window_bounds = array<i64: 1, 1, 32, 128>}, {pipeline_mode = #tpu.pipeline_mode<synchronous>, transform_indices = @transform_2, window_bounds = array<i64: 1, 128>}, {pipeline_mode = #tpu.pipeline_mode<synchronous>, transform_indices = @transform_3, window_bounds = array<i64: 128, 1>}, {pipeline_mode = #tpu.pipeline_mode<synchronous>, transform_indices = @transform_4, window_bounds = array<i64: 1, 1>}, {pipeline_mode = #tpu.pipeline_mode<synchronous>, transform_indices = @transform_5, window_bounds = array<i64: 2, 1>}]} {
    %c0_i32 = arith.constant 0 : i32
    %0 = arith.cmpi eq, %arg0, %c0_i32 : i32
    %c0_i32_0 = arith.constant 0 : i32
    %1 = arith.cmpi eq, %arg1, %c0_i32_0 : i32
    %2 = arith.andi %0, %1 : i1
    %3 = arith.extui %2 : i1 to i32
    %c0_i32_1 = arith.constant 0 : i32
    %4 = arith.cmpi ne, %3, %c0_i32_1 : i32
    scf.if %4 {
      %cst_14 = arith.constant 0.000000e+00 : f32
      %18 = vector.broadcast %cst_14 : f32 to vector<2x128xf32>
      %c0_15 = arith.constant 0 : index
      %c0_16 = arith.constant 0 : index
      %19 = vector.load %arg8[%c0_15, %c0_16] : memref<2x128xf32, #tpu.memory_space<vmem>>, vector<2x128xf32>
      tpu.vector_store %arg8[%c0_15, %c0_16], %18 {strides = array<i32>} : memref<2x128xf32, #tpu.memory_space<vmem>>, vector<2x128xf32>,
    } else {
    }
    %c0 = arith.constant 0 : index
    %c0_2 = arith.constant 0 : index
    %5 = vector.load %arg8[%c0, %c0_2] : memref<2x128xf32, #tpu.memory_space<vmem>>, vector<2x128xf32>
    %c0_3 = arith.constant 0 : index
    %c0_4 = arith.constant 0 : index
    %c0_5 = arith.constant 0 : index
    %c0_6 = arith.constant 0 : index
    %6 = vector.load %arg2[%c0_3, %c0_4, %c0_5, %c0_6] : memref<1x1x2x32xf32, #tpu.memory_space<vmem>>, vector<1x1x2x32xf32>
    %7 = vector.shape_cast %6 : vector<1x1x2x32xf32> to vector<2x32xf32>
    %c0_7 = arith.constant 0 : index
    %c0_8 = arith.constant 0 : index
    %c0_9 = arith.constant 0 : index
    %c0_10 = arith.constant 0 : index
    %8 = vector.load %arg3[%c0_7, %c0_8, %c0_9, %c0_10] : memref<1x1x32x128xf32, #tpu.memory_space<vmem>>, vector<1x1x32x128xf32>
    %9 = vector.shape_cast %8 : vector<1x1x32x128xf32> to vector<32x128xf32>
    %cst = arith.constant dense<0.000000e+00> : vector<2x128xf32>
    %10 = tpu.matmul %7, %9, %cst {dimension_numbers = #tpu.dot_dimension_numbers<[1], [0], [0], [1], [0, 0, 1, 1], [], []>} : vector<2x32xf32>, vector<32x128xf32>, vector<2x128xf32> -> vector<2x128xf32>
    %11 = arith.addf %5, %10 : vector<2x128xf32>
    %c0_11 = arith.constant 0 : index
    %c0_12 = arith.constant 0 : index
    %12 = vector.load %arg8[%c0_11, %c0_12] : memref<2x128xf32, #tpu.memory_space<vmem>>, vector<2x128xf32>
    tpu.vector_store %arg8[%c0_11, %c0_12], %11 {strides = array<i32>} : memref<2x128xf32, #tpu.memory_space<vmem>>, vector<2x128xf32>,
    %c1_i32 = arith.constant 1 : i32
    %13 = arith.cmpi eq, %arg0, %c1_i32 : i32
    %c7_i32 = arith.constant 7 : i32
    %14 = arith.cmpi eq, %arg1, %c7_i32 : i32
    %15 = arith.andi %13, %14 : i1
    %16 = arith.extui %15 : i1 to i32
    %c0_i32_13 = arith.constant 0 : i32
    %17 = arith.cmpi ne, %16, %c0_i32_13 : i32
    scf.if %17 {
      %c0_14 = arith.constant 0 : index
      %c0_15 = arith.constant 0 : index
      %18 = vector.load %arg8[%c0_14, %c0_15] : memref<2x128xf32, #tpu.memory_space<vmem>>, vector<2x128xf32>
      %c0_16 = arith.constant 0 : index
      %c0_17 = arith.constant 0 : index
      %19 = vector.load %arg4[%c0_16, %c0_17] : memref<1x128xf32, #tpu.memory_space<vmem>>, vector<1x128xf32>
      %20 = vector.broadcast %19 : vector<1x128xf32> to vector<2x128xf32>
      %21 = arith.addf %18, %20 : vector<2x128xf32>
      %cst_18 = arith.constant 0.000000e+00 : f32
      %22 = vector.broadcast %cst_18 : f32 to vector<2x128xf32>
      %23 = arith.cmpf oge, %21, %22 : vector<2x128xf32>
      %cst_19 = arith.constant 0.00999999977 : f32
      %24 = vector.broadcast %cst_19 : f32 to vector<2x128xf32>
      %25 = arith.mulf %24, %21 : vector<2x128xf32>
      %26 = arith.select %23, %21, %25 : vector<2x128xi1>, vector<2x128xf32>
      %c0_20 = arith.constant 0 : index
      %c0_21 = arith.constant 0 : index
      %27 = vector.load %arg5[%c0_20, %c0_21] : memref<128x1xf32, #tpu.memory_space<vmem>>, vector<128x1xf32>
      %cst_22 = arith.constant dense<0.000000e+00> : vector<2x1xf32>
      %28 = tpu.matmul %26, %27, %cst_22 {dimension_numbers = #tpu.dot_dimension_numbers<[1], [0], [0], [1], [0, 0, 1, 1], [], []>} : vector<2x128xf32>, vector<128x1xf32>, vector<2x1xf32> -> vector<2x1xf32>
      %c0_23 = arith.constant 0 : index
      %c0_24 = arith.constant 0 : index
      %29 = vector.load %arg6[%c0_23, %c0_24] : memref<1x1xf32, #tpu.memory_space<vmem>>, vector<1x1xf32>
      %30 = vector.broadcast %29 : vector<1x1xf32> to vector<2x1xf32>
      %31 = arith.addf %28, %30 : vector<2x1xf32>
      %32 = arith.negf %31 : vector<2x1xf32>
      %33 = math.exp %32 : vector<2x1xf32>
      %cst_25 = arith.constant 1.000000e+00 : f32
      %34 = vector.broadcast %cst_25 : f32 to vector<2x1xf32>
      %35 = arith.addf %34, %33 : vector<2x1xf32>
      %36 = arith.divf %34, %35 : vector<2x1xf32>
      %c0_26 = arith.constant 0 : index
      %c0_27 = arith.constant 0 : index
      %37 = vector.load %arg7[%c0_26, %c0_27] : memref<2x1xf32, #tpu.memory_space<vmem>>, vector<2x1xf32>
      tpu.vector_store %arg7[%c0_26, %c0_27], %36 {strides = array<i32>} : memref<2x1xf32, #tpu.memory_space<vmem>>, vector<2x1xf32>,
    } else {
    }
    return
  }
  func.func @transform_0(%arg0: i32, %arg1: i32) -> (i32, i32, i32, i32) {
    %c0_i32 = arith.constant 0 : i32
    %c0_i32_0 = arith.constant 0 : i32
    %c0_i32_1 = arith.constant 0 : i32
    return %arg0, %arg1, %c0_i32, %c0_i32_0 : i32, i32, i32, i32
  }
  func.func @transform_1(%arg0: i32, %arg1: i32) -> (i32, i32, i32, i32) {
    %c0_i32 = arith.constant 0 : i32
    %c0_i32_0 = arith.constant 0 : i32
    %c0_i32_1 = arith.constant 0 : i32
    return %arg1, %arg0, %c0_i32, %c0_i32_0 : i32, i32, i32, i32
  }
  func.func @transform_2(%arg0: i32, %arg1: i32) -> (i32, i32) {
    %c0_i32 = arith.constant 0 : i32
    %c0_i32_0 = arith.constant 0 : i32
    %c0_i32_1 = arith.constant 0 : i32
    return %c0_i32, %c0_i32_0 : i32, i32
  }
  func.func @transform_3(%arg0: i32, %arg1: i32) -> (i32, i32) {
    %c0_i32 = arith.constant 0 : i32
    %c0_i32_0 = arith.constant 0 : i32
    %c0_i32_1 = arith.constant 0 : i32
    return %c0_i32, %c0_i32_0 : i32, i32
  }
  func.func @transform_4(%arg0: i32, %arg1: i32) -> (i32, i32) {
    %c0_i32 = arith.constant 0 : i32
    %c0_i32_0 = arith.constant 0 : i32
    %c0_i32_1 = arith.constant 0 : i32
    return %c0_i32, %c0_i32_0 : i32, i32
  }
  func.func @transform_5(%arg0: i32, %arg1: i32) -> (i32, i32) {
    %c0_i32 = arith.constant 0 : i32
    %c0_i32_0 = arith.constant 0 : i32
    %c0_i32_1 = arith.constant 0 : i32
    return %c0_i32, %c0_i32_0 : i32, i32
  }
}

</mosaic_0001>

<bundles_post_ra>
// kernel: rnn_classifier_forward.3
= control target key start
LH: loop header
LB: loop body
LE: loop exit
PB: predicated region body
PF: predicated region fallthrough
CT: control target
= control target key end

     0   :  { %s463_s12 = smov 0   ;;  %s465_s13 = smov 0   ;;  %s505_s0 = inlined_call_operand.vmem [shape: f32[16,16], index: 0, kind: input, shape index: {}]   ;;  %s506_s1 = inlined_call_operand.vmem [shape: f32[2,16,96], index: 1, kind: input, shape index: {}]   ;;  %s507_s2 = inlined_call_operand.vmem [shape: f32[2,1,96], index: 2, kind: input, shape index: {}]   ;;  %s508_s3 = inlined_call_operand.vmem [shape: f32[2,16,96], index: 3, kind: output, shape index: {}]  }
   0x1   :  { %s467_s14 = smov 0  }
   0x2 LB: > { %s25_s15 = sadd.s32 1, %s437_s13  ;;  %p381_p0 = scmp.ge.s32.totalorder %s441_s14, 1  ;;  %s441_s14 = sphi %s467_s14, %s13_s14   ;;  %s437_s13 = sphi %s465_s13, %s510_s13   ;;  %s433_s12 = sphi %s463_s12, %s509_s12  }
   0x3   : > { %p27_p1 = scmp.ge.s32.totalorder %s25_s15, 2  ;;  %p170_p2 = scmp.lt.s32.totalorder %s441_s14, 3 }
   0x5   : > { %s512_s15 = smov (%p27_p1, %s25_s15), 0  ;;  %p171_p3 = pnand %p381_p0, %p170_p2 }
   0x6   : > { %p212_p4 = scmp.lt.s32.totalorder (!%p171_p3), %s433_s12, 1 }
   0x7   : > { %174 = sbr.rel (%p171_p3) target bundleno = 149 (0x95), region = 32 }
   0xc   : > { %s514_s12 = smov (!%p212_p4, %s433_s12), 1  ;;  %v230_v2 = vld [vmem:[%s505_s0] sm:$0xff]  ;;  %vm238_vm0 = vcmask 130048   ;;  %v231_v3 = vld [vmem:[%s505_s0 + $0x8] sm:$0xff]  ;;  %vm268_vm1 = vcmask 785408  }
   0xd   : > { %s390_s16 = sshll.u32 %s514_s12, 4  ;;  %s219_s19 = scalar_lea.vmem %s507_s2, %s514_s12 }
   0xe   : > { %s216_s22 = scalar_lea.vmem %s506_s1, %s390_s16  ;;  %v418_v4 = vld [vmem:[%s219_s19] ss:$0 sm:$0xff]  ;;  %s228_s29 = scalar_lea.vmem %s508_s3, %s390_s16 }
   0xf   : > { %v233_v0 = vld [vmem:[%s216_s22 + $0x8] sm:$0xff]  ;;  %v232_v1 = vld [vmem:[%s216_s22] sm:$0xff] }
  0x10   : > { %259 = vmatpush.msra.mxu0 %v233_v0  ;;  %392 = vmatpush.msra.mxu1 %v233_v0 }
  0x12   : > { %260 = vmatpush.msra.mxu0 %v232_v1  ;;  %393 = vmatpush.msra.mxu1 %v232_v1 }
  0x13   : > { %386 = vmatmul.msk.f32.vlgmr.msra.gmra.mxu0 %vm238_vm0, %v230_v2  ;;  %387 = vmatmul.msk.f32.vlgmr.msra.gmra.mxu1 %vm238_vm0, %v231_v3 }
  0x90   : > { %v262_v5 = vpop.f32.mrf.mxu0  ;;  %v265_v6 = vpop.f32.mrf.mxu1 }
  0x91   : > { %v263_v7 = vadd.f32 %v418_v4, %v262_v5  ;;  %v266_v8 = vadd.f32 %v418_v4, %v265_v6 }
  0x93   : > { %269 = vst.msk [vmem:[%s228_s29] sm:$0xff] %vm268_vm1, %v263_v7 }
  0x94   : > { %270 = vst.msk [vmem:[%s228_s29 + $0x8] sm:$0xff] %vm268_vm1, %v266_v8 }
  0x95 PF: > { %s13_s14 = sadd.s32 1, %s441_s14   ;;  %s509_s12 = smov %s437_s13 }
  0x96   : > { %p10_p5 = scmp.ge.s32.totalorder %s13_s14, 4   ;;  %s510_s13 = smov %s512_s15 }
  0x98   :  { %12 = sbr.rel (!%p10_p5) target bundleno = 2 (0x2), region = 68 }

// kernel: rnn_classifier_forward.4
= control target key start
LH: loop header
LB: loop body
LE: loop exit
PB: predicated region body
PF: predicated region fallthrough
CT: control target
= control target key end

     0   :  { %s634_s12 = smov 0   ;;  %s636_s13 = smov 0   ;;  %s702_s0 = inlined_call_operand.vmem [shape: f32[2,8,2,96], index: 0, kind: input, shape index: {}]   ;;  %s703_s1 = inlined_call_operand.vmem [shape: f32[2,32,96], index: 1, kind: input, shape index: {}]   ;;  %s704_s2 = inlined_call_operand.vmem [shape: f32[2,1,32], index: 2, kind: input, shape index: {}]   ;;  %s705_s3 = inlined_call_operand.vmem [shape: f32[2,8,2,32], index: 3, kind: output, shape index: {}]  }
   0x1   :  { %s638_s14 = smov 0   ;;  %s640_s15 = smov 0  }
   0x2   :  { %s642_s16 = smov 0  }
   0x3 LB: > { %s22_s17 = sadd.s32 1, %s600_s14  ;;  %s25_s18 = sadd.s32 1, %s604_s15  ;;  %s608_s16 = sphi %s642_s16, %s13_s16   ;;  %s604_s15 = sphi %s640_s15, %s709_s15   ;;  %s600_s14 = sphi %s638_s14, %s708_s14   ;;  %s596_s13 = sphi %s636_s13, %s707_s13   ;;  %s592_s12 = sphi %s634_s12, %s706_s12  }
   0x4   : > { %p23_p0 = scmp.ge.s32.totalorder %s22_s17, 8  ;;  %p504_p1 = scmp.ge.s32.totalorder %s608_s16, 1 }
   0x5   : > { %p198_p2 = scmp.lt.s32.totalorder %s608_s16, 17 }
   0x6   : > { %s711_s17 = smov (%p23_p0, %s22_s17), 0  ;;  %s713_s18 = smov (!%p23_p0, %s25_s18), %s604_s15 }
   0x7   : > { %p199_p3 = pnand %p504_p1, %p198_p2  ;;  %p27_p4 = scmp.ge.s32.totalorder %s713_s18, 2 }
   0x8   : > { %s505_s19 = sshll.u32 (!%p199_p3), %s592_s12, 1  ;;  %p248_p5 = scmp.lt.s32.totalorder (!%p199_p3), %s596_s13, 1 }
   0x9   : > { %s715_s18 = smov (%p27_p4, %s713_s18), 0  ;;  %202 = sbr.rel (%p199_p3) target bundleno = 614 (0x266), region = 32 }
   0xa   : > { %s245_s20 = ssub.s32 (!%p199_p3), 7, %s505_s19  ;;  %p513_p7 = scmp.ne.s32.totalorder (!%p199_p3), %s592_s12, 0 }
   0xb   : > { %s246_s21 = smul.u32 (!%p199_p3), %s596_s13, %s245_s20 }
   0xd   : > { %s247_s22 = sadd.s32 (!%p199_p3), %s592_s12, %s246_s21 }
   0xe   : > { %s717_s13 = smov (!%p248_p5, %s596_s13), 1  ;;  %p250_p6 = scmp.lt.s32.totalorder %s247_s22, 7 }
   0xf   : > { %s506_s23 = sshll.u32 %s717_s13, 3  ;;  %s518_s24 = sshll.u32 %s717_s13, 5 }
  0x10   : > { %s267_s27 = scalar_lea.vmem %s704_s2, %s717_s13  ;;  %s719_s22 = smov (!%p250_p6, %s247_s22), 7 }
  0x11   : > { %s264_s30 = scalar_lea.vmem %s703_s1, %s518_s24  ;;  %s253_s4 = sadd.s32 %s506_s23, %s719_s22 }
  0x12   : > { %s507_s5 = sshll.u32 %s253_s4, 1  ;;  %287 = sbr.rel (%p513_p7) target bundleno = 25 (0x19), region = 36 }
  0x13   : > { %s255_s8 = scalar_lea.vmem %s702_s0, %s507_s5  ;;  %s680_s11 = scalar_lea.vmem %s705_s3, %s507_s5 }
  0x17   : > { %vm288_vm0 = vcmask 254976   ;;  %v610_v0 = vmov 0.0  }
  0x18   : > { %289 = vst.msk [vmem:[#allocation2] sm:$0x3] %vm288_vm0, %v610_v0 }
  0x19 PF: > { %v295_v1 = vld [vmem:[%s264_s30 + $0x18] sm:$0xff]  ;;  %v294_v2 = vld [vmem:[%s264_s30 + $0x10] sm:$0xff]  ;;  %v293_v4 = vld [vmem:[%s264_s30 + $0x8] sm:$0xff]  ;;  %s611_s13 = smov 32   ;;  %s612_s19 = smov 64   ;;  %vm296_vm1 = vcmask 261120  }
  0x1a   : > { %312 = vmatpush.msra.mxu0 %v295_v1  ;;  %v563_v5 = vld [vmem:[%s267_s27] ss:$0 sm:$0xff]  ;;  %s613_s12 = smov 96   ;;  %vm373_vm6 = vcmask 254976  }
  0x1b   : > { %v292_v6 = vld [vmem:[%s264_s30] sm:$0xff]  ;;  %343 = vrot.lane.b32.xlu0 %v563_v5, %s612_s19 }
  0x1c   : > { %313 = vmatpush.msra.mxu0 %v294_v2  ;;  %v291_v10 = vld [vmem:[%s255_s8] sm:$0x3] }
  0x1e   : > { %314 = vmatpush.msra.mxu0 %v293_v4 }
  0x1f   : > { %v290_v3 = vld [vmem:[#allocation2] sm:$0x3] }
  0x20   : > { %364 = vrot.lane.b32.xlu2 %v290_v3, %s611_s13  ;;  %315 = vmatpush.msra.mxu0 %v292_v6 }
  0x21   : > { %514 = vmatmul.msk.f32.vlgmr.msra.gmra.mxu0 %vm296_vm1, %v290_v3 }
  0x7a   : > { %v365_v30 = vpop.permute.xlu2 %364 }
  0x8d   : > { %v344_v7 = vpop.permute.xlu0 %343 }
  0x9e   : > { %v317_v8 = vpop.f32.mrf.mxu0 }
  0x9f   : > { %v346_v9 = vadd.f32 %v344_v7, %v317_v8  ;;  %v320_v11 = vadd.f32 %v317_v8, %v291_v10 }
  0xa1   : > { %348 = vrot.lane.b32.xlu0 %v346_v9, %s612_s19  ;;  %v515_v12 = vmul.f32 -1.442695, %v320_v11 }
  0xa3   : > { %564 = vpow2.f32 %v515_v12 }
  0xa9   : > { %v565_v13 = vpop.eup %564 }
  0xaa   : > { %v324_v14 = vadd.f32 1.0, %v565_v13 }
  0xac   : > { %566 = vrcp.f32 %v324_v14  ;;  %v336_v20 = vand.u32 2147483648, %v324_v14  ;;  %vm330_vm3 = vweird.f32 %v324_v14  ;;  %v334_v21 = vand.u32 2147483647, %v324_v14 }
  0xae   : > { %v337_v23 = vor.u32 1.1754944e-38, %v336_v20  ;;  %vm335_vm5 = vcmp.eq.f32.partialorder %v334_v21, 8.507059e+37 }
  0xb2   : > { %v567_v15 = vpop.eup %566 }
  0xb3   : > { %v326_v16 = vmul.f32 %v567_v15, %v324_v14  ;;  %vm331_vm2 = vweird.f32 %v567_v15 }
  0xb4   : > { %vm332_vm4 = vmor %vm330_vm3, %vm331_vm2 }
  0xb5   : > { %v327_v17 = vsub.f32 1.0, %v326_v16 }
  0xb7   : > { %v328_v18 = vmul.f32 %v567_v15, %v327_v17 }
  0xb9   : > { %v329_v19 = vadd.f32 %v567_v15, %v328_v18 }
  0xbb   : > { %v333_v22 = vsel %vm332_vm4, %v567_v15, %v329_v19 }
  0xbc   : > { %v338_v24 = vsel %vm335_vm5, %v337_v23, %v333_v22 }
  0xbd   : > { %v358_v31 = vsub.f32 1.0, %v338_v24  ;;  %v367_v33 = vmul.f32 %v365_v30, %v338_v24 }
 0x113   : > { %v349_v25 = vpop.permute.xlu0 %348 }
 0x114   : > { %v351_v26 = vmul.f32 %v349_v25, %v338_v24 }
 0x116   : > { %353 = vrot.lane.b32.xlu1 %v351_v26, %s612_s19 }
 0x188   : > { %v354_v27 = vpop.permute.xlu1 %353 }
 0x189   : > { %v356_v28 = vadd.f32 %v354_v27, %v291_v10 }
 0x18b   : > { %568 = vtanh.f32 %v356_v28 }
 0x191   : > { %v569_v29 = vpop.eup %568 }
 0x192   : > { %360 = vrot.lane.b32.xlu1 %v569_v29, %s613_s12 }
 0x204   : > { %v361_v32 = vpop.permute.xlu1 %360 }
 0x205   : > { %v363_v34 = vmul.f32 %v361_v32, %v358_v31 }
 0x207   : > { %v368_v35 = vadd.f32 %v367_v33, %v363_v34 }
 0x209   : > { %370 = vrot.lane.b32.xlu2 %v368_v35, %s613_s12 }
 0x263   : > { %v371_v36 = vpop.permute.xlu2 %370 }
 0x264   : > { %374 = vst.msk [vmem:[#allocation2] sm:$0x3] %vm373_vm6, %v371_v36 }
 0x265   : > { %375 = vst.msk [vmem:[%s680_s11] sm:$0x3] %vm373_vm6, %v371_v36 }
 0x266 PF: > { %s13_s16 = sadd.s32 1, %s608_s16   ;;  %s706_s12 = smov %s600_s14 }
 0x267   : > { %p10_p8 = scmp.ge.s32.totalorder %s13_s16, 18   ;;  %s707_s13 = smov %s604_s15 }
 0x268   : > { %s708_s14 = smov %s711_s17  ;;  %s709_s15 = smov %s715_s18 }
 0x269   :  { %12 = sbr.rel (!%p10_p8) target bundleno = 3 (0x3), region = 72 }

// kernel: rnn_classifier_forward.5
= control target key start
LH: loop header
LB: loop body
LE: loop exit
PB: predicated region body
PF: predicated region fallthrough
CT: control target
= control target key end

     0   :  { %s870_s0 = inlined_call_operand.vmem [shape: f32[2,8,2,32], index: 0, kind: input, shape index: {}]   ;;  %s871_s1 = inlined_call_operand.hbm [shape: f32[8,2,32,128], index: 1, kind: input, shape index: {}]   ;;  %s872_s2 = inlined_call_operand.vmem [shape: f32[1,128], index: 2, kind: input, shape index: {}]   ;;  %s873_s3 = inlined_call_operand.vmem [shape: f32[128,1], index: 3, kind: input, shape index: {}]   ;;  %s874_s4 = inlined_call_operand.<no memory space> [shape: f32[1,1], index: 4, kind: input, shape index: {}]   ;;  %s875_s5 = inlined_call_operand.vmem [shape: f32[2,1], index: 5, kind: output, shape index: {}]  }
   0x1   :  { %v10_v0 = vstv %s874_s4 }
   0x2   :  { %11 = vst [vmem:[#allocation3] sm:$0x1] %v10_v0 }
   0x3   :  { %12 = vsyncpa [#allocation5], 0 }
   0x4   :  { %14 = vsyncpa [#allocation5 + $0x1], 0  ;;  %s697_s20 = smov 0   ;;  %s699_s21 = smov 0  }
   0x5   :  { %s701_s22 = smov 0   ;;  %s703_s23 = smov 0  }
   0x6   :  { %s705_s24 = smov 0   ;;  %s707_s25 = smov 0  }
   0x7   :  { %s709_s26 = smov 0   ;;  %s711_s27 = smov 0  }
   0x8 LB: > { %s468_s4 = sadd.s32 4294967295, %s659_s27   ;;  %s29_s28 = sadd.s32 1, %s651_s25  ;;  %s659_s27 = sphi %s711_s27, %s20_s27   ;;  %s655_s26 = sphi %s709_s26, %s887_s26   ;;  %s651_s25 = sphi %s707_s25, %s886_s25   ;;  %s647_s24 = sphi %s705_s24, %s885_s24   ;;  %s643_s23 = sphi %s703_s23, %s884_s23   ;;  %s639_s22 = sphi %s701_s22, %s883_s22   ;;  %s635_s21 = sphi %s699_s21, %s882_s21   ;;  %s631_s20 = sphi %s697_s20, %s881_s20  }
   0x9   : > { %p30_p0 = scmp.ge.s32.totalorder %s29_s28, 8  ;;  %s32_s29 = sadd.s32 1, %s655_s26 }
   0xa   : > { %s69_s30 = sadd.s32 1, %s639_s22  ;;  %p76_p1 = scmp.ne.s32.totalorder %s639_s22, %s635_s21 }
   0xb   : > { %s889_s28 = smov (%p30_p0, %s29_s28), 0  ;;  %s891_s29 = smov (!%p30_p0, %s32_s29), %s655_s26 }
   0xc   : > { %s64_s6 = ssub.s32 %s651_s25, %s889_s28  ;;  %p77_p2 = scmp.eq.s32.totalorder %s659_s27, 0 }
   0xd   : > { %p34_p3 = scmp.ge.s32.totalorder %s891_s29, 2  ;;  %p82_p4 = scmp.ne.s32.totalorder %s635_s21, %s631_s20 }
   0xe   : > { %p748_p5 = por %p77_p2, %p76_p1  ;;  %p83_p6 = scmp.eq.s32.totalorder %s468_s4, 0 }
   0xf   : > { %s893_s29 = smov (%p34_p3, %s891_s29), 0  ;;  %p489_p8 = scmp.lt.s32.totalorder %s659_s27, 16 }
  0x10   : > { %878 = sst [smem:[#allocation7_spill]] %s893_s29  ;;  %p754_p7 = por %p83_p6, %p82_p4 }
  0x11   : > { %s65_s9 = ssub.s32 %s655_s26, %s893_s29  ;;  %s210_s11 = sand.u32 1, %s639_s22  }
  0x12   : > { %s66_s10 = sor.u32 %s65_s9, %s64_s6  ;;  %s471_s12 = sshll.u32 %s210_s11, 5 }
  0x13   : > { %p67_p9 = scmp.eq.s32.totalorder %s66_s10, 0  ;;  %s472_s13 = sshll.u32 %s655_s26, 2 }
  0x14   : > { %s473_s15 = sshll.u32 %s651_s25, 3  ;;  %s214_s17 = scalar_lea.vmem [#allocation4], %s471_s12 }
  0x15   : > { %s764_s14 = scalar_select %p67_p9, %s639_s22, %s69_s30  }
  0x16   : > { %s219_s16 = sadd.s32 %s473_s15, %s472_s13  ;;  %s224_s18 = sshll.u32 %s214_s17, 4  ;;  %s225_s18 = int_to_ptr.vmem [resolvable:$true] %s224_s18 }
  0x17   : > { %s474_s19 = sshll.u32 %s219_s16, 3  ;;  %p486_p10 = pnand %p489_p8, %p748_p5 }
  0x18   : > { %s221_s29 = scalar_lea.hbm %s871_s1, %s474_s19  ;;  %p475_p11 = scmp.ge.s32.totalorder %s659_s27, 1 }
  0x19   : > { %s222_s6 = sshll.u32 %s221_s29, 4  ;;  %s211_s9 = scalar_lea.sflag [#allocation5], %s210_s11  ;;  %s223_s6 = int_to_ptr.hbm [resolvable:$true] %s222_s6 }
  0x1a   : > { %s661_s30 = smov 128   ;;  %s662_s10 = smov 8  }
  0x1b   : > { %488 = dma.hbm_to_vmem [thread:$0]  (!%p486_p10), %s223_s6, 512, %s225_s18, %s211_s9, %s661_s30, %s661_s30, %s662_s10  }
  0x1c   : > { %p232_p12 = scmp.lt.s32.totalorder %s659_s27, 17 }
  0x1e   : > { %p233_p13 = pnand %p475_p11, %p232_p12 }
  0x1f   : > { %s238_s12 = sand.u32 (!%p233_p13), 1, %s635_s21  }
  0x20   : > { %236 = sbr.rel (%p233_p13) target bundleno = 377 (0x179), region = 40  ;;  %s476_s13 = sshll.u32 (!%p233_p13), %s238_s12, 5 }
  0x21   : > { %s239_s15 = scalar_lea.sflag (!%p233_p13), [#allocation5], %s238_s12  ;;  %s242_s16 = scalar_lea.vmem (!%p233_p13), [#allocation4], %s476_s13 }
  0x25   : > { %626 = dma.done.wait (%p754_p7), %s239_s15, 512  }
  0x26   : > { %628 = vsyncadd (%p754_p7), %s239_s15, 4294966784  ;;  %p273_p0 = scmp.lt.s32.totalorder %s647_s24, 1  ;;  %p275_p1 = scmp.lt.s32.totalorder %s643_s23, 7 }
  0x27   : > { %p281_p2 = scmp.eq.s32.totalorder %s647_s24, 0  ;;  %p282_p3 = scmp.eq.s32.totalorder %s643_s23, 0 }
  0x28   : > { %s274_s29 = scalar_select %p273_p0, %s647_s24, 1 }
  0x29   : > { %s276_s7 = scalar_select %p275_p1, %s643_s23, 7 }
  0x2a   : > { %s477_s11 = sshll.u32 %s274_s29, 3  ;;  %p283_p4 = pnand %p282_p3, %p281_p2 }
  0x2b   : > { %s278_s17 = sadd.s32 %s477_s11, %s276_s7 }
  0x2c   : > { %s478_s18 = sshll.u32 %s278_s17, 1  ;;  %286 = sbr.rel (%p283_p4) target bundleno = 51 (0x33), region = 48 }
  0x2d   : > { %s280_s8 = scalar_lea.vmem %s870_s0, %s478_s18 }
  0x31   : > { %v663_v1 = vmov 0.0  }
  0x32   : > { %287 = vst [vmem:[#allocation2] sm:$0x3] %v663_v1 }
  0x33 PF: > { %v293_v2 = vld [vmem:[%s242_s16 + $0x18] sm:$0xff]  ;;  %v292_v3 = vld [vmem:[%s242_s16 + $0x10] sm:$0xff]  ;;  %v291_v4 = vld [vmem:[%s242_s16 + $0x8] sm:$0xff]  ;;  %vm294_vm0 = vcmask 261120   ;;  %p320_p5 = scmp.eq.s32.totalorder %s647_s24, 1  ;;  %p321_p6 = scmp.eq.s32.totalorder %s643_s23, 7 }
  0x34   : > { %310 = vmatpush.msra.mxu0 %v293_v2  ;;  %v290_v5 = vld [vmem:[%s242_s16] sm:$0xff]  ;;  %v289_v6 = vld [vmem:[%s280_s8] sm:$0x3] }
  0x35   : > { %p322_p7 = pnand %p321_p6, %p320_p5 }
  0x36   : > { %311 = vmatpush.msra.mxu0 %v292_v3 }
  0x38   : > { %312 = vmatpush.msra.mxu0 %v291_v4 }
  0x39   : > { %v288_v7 = vld [vmem:[#allocation2] sm:$0x3] }
  0x3a   : > { %313 = vmatpush.msra.mxu0 %v290_v5 }
  0x3b   : > { %479 = vmatmul.msk.f32.vlgmr.msra.gmra.mxu0 %vm294_vm0, %v289_v6 }
  0xb7   : > { %325 = sbr.rel (%p322_p7) target bundleno = 377 (0x179), region = 52 }
  0xb8   : > { %v315_v8 = vpop.f32.mrf.mxu0 }
  0xb9   : > { %v318_v9 = vadd.f32 %v315_v8, %v288_v7 }
  0xbb   : > { %319 = vst [vmem:[#allocation2] sm:$0x3] %v318_v9 }
  0xbc   : > { %v350_v10 = vld [vmem:[%s873_s3 + $0x78] sm:$0xff]  ;;  %v349_v11 = vld [vmem:[%s873_s3 + $0x70] sm:$0xff]  ;;  %v348_v12 = vld [vmem:[%s873_s3 + $0x68] sm:$0xff]  ;;  %vm394_vm5 = vcmask 1024  }
  0xbd   : > { %355 = vmatpush.msra.mxu0 %v350_v10  ;;  %v347_v13 = vld [vmem:[%s873_s3 + $0x60] sm:$0xff]  ;;  %v346_v14 = vld [vmem:[%s873_s3 + $0x58] sm:$0xff]  ;;  %v345_v15 = vld [vmem:[%s873_s3 + $0x50] sm:$0xff] }
  0xbe   : > { %v344_v16 = vld [vmem:[%s873_s3 + $0x48] sm:$0xff]  ;;  %v343_v17 = vld [vmem:[%s873_s3 + $0x40] sm:$0xff]  ;;  %v342_v18 = vld [vmem:[%s873_s3 + $0x38] sm:$0xff] }
  0xbf   : > { %356 = vmatpush.msra.mxu0 %v349_v11  ;;  %v341_v19 = vld [vmem:[%s873_s3 + $0x30] sm:$0xff]  ;;  %v557_v20 = vld [vmem:[%s872_s2] ss:$0 sm:$0xff]  ;;  %v340_v21 = vld [vmem:[%s873_s3 + $0x28] sm:$0xff] }
  0xc0   : > { %v339_v23 = vld [vmem:[%s873_s3 + $0x20] sm:$0xff]  ;;  %v338_v25 = vld [vmem:[%s873_s3 + $0x18] sm:$0xff]  ;;  %v337_v26 = vld [vmem:[%s873_s3 + $0x10] sm:$0xff] }
  0xc1   : > { %357 = vmatpush.msra.mxu0 %v348_v12  ;;  %v336_v28 = vld [vmem:[%s873_s3 + $0x8] sm:$0xff]  ;;  %v335_v29 = vld [vmem:[%s873_s3] sm:$0xff] }
  0xc2   : > { %v326_v22 = vld [vmem:[#allocation2] sm:$0x3]  ;;  %v558_v31 = vld [vmem:[#allocation3] ss:$0 sm:$0xff] }
  0xc3   : > { %358 = vmatpush.msra.mxu0 %v347_v13  ;;  %v331_v24 = vadd.f32 %v557_v20, %v326_v22 }
  0xc5   : > { %359 = vmatpush.msra.mxu0 %v346_v14  ;;  %v333_v27 = vmul.f32 0.01, %v331_v24  ;;  %vm332_vm1 = vcmp.ge.f32.partialorder %v331_v24, 0.0 }
  0xc7   : > { %360 = vmatpush.msra.mxu0 %v345_v15  ;;  %v334_v30 = vsel %vm332_vm1, %v331_v24, %v333_v27 }
  0xc9   : > { %361 = vmatpush.msra.mxu0 %v344_v16 }
  0xcb   : > { %362 = vmatpush.msra.mxu0 %v343_v17 }
  0xcd   : > { %363 = vmatpush.msra.mxu0 %v342_v18 }
  0xcf   : > { %364 = vmatpush.msra.mxu0 %v341_v19 }
  0xd1   : > { %365 = vmatpush.msra.mxu0 %v340_v21 }
  0xd3   : > { %366 = vmatpush.msra.mxu0 %v339_v23 }
  0xd5   : > { %367 = vmatpush.msra.mxu0 %v338_v25 }
  0xd7   : > { %368 = vmatpush.msra.mxu0 %v337_v26 }
  0xd9   : > { %369 = vmatpush.msra.mxu0 %v336_v28 }
  0xdb   : > { %370 = vmatpush.msra.mxu0 %v335_v29 }
  0xdc   : > { %371 = vmatmul.f32.vlgmr.msra.gmra.mxu0 %v334_v30 }
 0x159   : > { %v372_v32 = vpop.f32.mrf.mxu0 }
 0x15a   : > { %v373_v33 = vadd.f32 %v558_v31, %v372_v32 }
 0x15c   : > { %v480_v34 = vmul.f32 -1.442695, %v373_v33 }
 0x15e   : > { %559 = vpow2.f32 %v480_v34 }
 0x164   : > { %v560_v35 = vpop.eup %559 }
 0x165   : > { %v378_v36 = vadd.f32 1.0, %v560_v35 }
 0x167   : > { %561 = vrcp.f32 %v378_v36  ;;  %v390_v40 = vand.u32 2147483648, %v378_v36  ;;  %v388_v42 = vand.u32 2147483647, %v378_v36  ;;  %vm384_vm3 = vweird.f32 %v378_v36 }
 0x169   : > { %v391_v44 = vor.u32 1.1754944e-38, %v390_v40  ;;  %vm389_vm6 = vcmp.eq.f32.partialorder %v388_v42, 8.507059e+37 }
 0x16d   : > { %v562_v37 = vpop.eup %561 }
 0x16e   : > { %v380_v38 = vmul.f32 %v562_v37, %v378_v36  ;;  %vm385_vm2 = vweird.f32 %v562_v37 }
 0x16f   : > { %vm386_vm4 = vmor %vm384_vm3, %vm385_vm2 }
 0x170   : > { %v381_v39 = vsub.f32 1.0, %v380_v38 }
 0x172   : > { %v382_v41 = vmul.f32 %v562_v37, %v381_v39 }
 0x174   : > { %v383_v43 = vadd.f32 %v562_v37, %v382_v41 }
 0x176   : > { %v387_v45 = vsel %vm386_vm4, %v562_v37, %v383_v43 }
 0x177   : > { %v392_v46 = vsel %vm389_vm6, %v391_v44, %v387_v45 }
 0x178   : > { %395 = vst.msk [vmem:[%s875_s5] sm:$0x3] %vm394_vm5, %v392_v46 }
 0x179 PF: > { %s20_s27 = sadd.s32 1, %s659_s27   ;;  %s880_s8 = sld [smem:[#allocation7_spill]] }
 0x17a   : > { %p17_p8 = scmp.ge.s32.totalorder %s20_s27, 18   ;;  %s881_s20 = smov %s635_s21 }
 0x17b   : > { %s882_s21 = smov %s639_s22  ;;  %s883_s22 = smov %s764_s14 }
 0x17c   : > { %s884_s23 = smov %s651_s25  ;;  %s885_s24 = smov %s655_s26 }
 0x17d   : > { %s886_s25 = smov %s889_s28  ;;  %19 = sbr.rel (!%p17_p8) target bundleno = 8 (0x8), region = 87 }
 0x17f   : > { %s887_s26 = smov %s880_s8 }
 0x182   :  { %407 = vsyncpa [#allocation5], 1 }
 0x183   :  { %409 = vsyncpa [#allocation5 + $0x1], 1 }

</bundles_post_ra>
